<compile_context>
chip_gen: v7x
topology: tpu7x:2x2x1
jax: 0.10.0
libtpu: 0.0.40
codegen_flags: <defaults>
</compile_context>

<pallas_src>
import jax
import jax.numpy as jnp
from jax.experimental import pallas as pl
from jax.experimental.pallas import tpu as pltpu


# ----------------------------- kernel ---------------------------------------


def _make_kernel(ips, H, W, Cin, C):
    """Build the fused kernel for `ips` images per grid step."""
    Hh, Wh = H // 2, W // 2
    Hq, Wq = Hh // 2, Wh // 2

    def kernel(x_ref, w1_ref, b1_ref, w2_ref, b2_ref, o_ref, xp2):
        # x_ref : (ips, H+2, W*Cin)   height-padded, lane-dense image(s), f32
        # w1_ref: (3, W*Cin, W*C)     banded width-conv matrices (per dy), bf16
        # b1_ref: (1, W*C)            folded conv+BN bias, tiled over W, f32
        # w2_ref: (3, Wh*C, Wh*C)     stage-2 banded matrices, bf16
        # b2_ref: (1, Wh*C)
        # o_ref : (ips, Hq, Wq*C)     pooled output (lane-packed wq*C)
        # xp2   : (ips, Hh+2, Wh*C)   stage-2 height-padded input scratch (VMEM)

        # -------- stage 1: conv3x3 ("same") + folded-BN bias + ReLU ----------
        # 3 accumulating matmuls (one per dy); width taps + zero padding are
        # encoded in the banded weight matrix, so the LHS stays lane-dense.
        acc = jnp.zeros((ips * H, W * C), jnp.float32)
        for dy in range(3):
            lhs = x_ref[:, pl.ds(dy, H), :].reshape(ips * H, W * Cin)
            acc = acc + jnp.dot(lhs.astype(jnp.bfloat16), w1_ref[dy],
                                preferred_element_type=jnp.float32)
        y1 = jnp.maximum(acc + b1_ref[...], 0.0)            # (ips*H, W*C)

        # -------- 2x2 / stride-2 max-pool, entirely in registers -------------
        y1p = y1.reshape(ips * Hh, 2, W * C)                 # pair rows (h even/odd)
        p1h = jnp.maximum(y1p[:, 0, :], y1p[:, 1, :])        # (ips*Hh, W*C)
        p1 = jnp.concatenate(
            [jnp.maximum(p1h[:, (2 * j) * C:(2 * j + 1) * C],
                         p1h[:, (2 * j + 1) * C:(2 * j + 2) * C])
             for j in range(Wh)], axis=-1)                   # (ips*Hh, Wh*C)

        # -------- stage-2 input: zero only the 1-row height halo -------------
        zrow = jnp.zeros((ips, 1, Wh * C), jnp.float32)
        xp2[:, pl.ds(0, 1), :] = zrow
        xp2[:, pl.ds(Hh + 1, 1), :] = zrow
        xp2[:, pl.ds(1, Hh), :] = p1.reshape(ips, Hh, Wh * C)

        # -------- stage 2: conv3x3 + bias + ReLU (stays in VMEM) -------------
        acc2 = jnp.zeros((ips * Hh, Wh * C), jnp.float32)
        for dy in range(3):
            lhs2 = xp2[:, pl.ds(dy, Hh), :].reshape(ips * Hh, Wh * C)
            acc2 = acc2 + jnp.dot(lhs2.astype(jnp.bfloat16), w2_ref[dy],
                                  preferred_element_type=jnp.float32)
        y2 = jnp.maximum(acc2 + b2_ref[...], 0.0)            # (ips*Hh, Wh*C)

        # -------- second 2x2 max-pool, store lane-packed output --------------
        y2p = y2.reshape(ips * Hq, 2, Wh * C)
        p2h = jnp.maximum(y2p[:, 0, :], y2p[:, 1, :])        # (ips*Hq, Wh*C)
        p2 = jnp.concatenate(
            [jnp.maximum(p2h[:, (2 * j) * C:(2 * j + 1) * C],
                         p2h[:, (2 * j + 1) * C:(2 * j + 2) * C])
             for j in range(Wq)], axis=-1)                   # (ips*Hq, Wq*C)
        o_ref[...] = p2.reshape(ips, Hq, Wq * C)

    return kernel


# ----------------------------- wrapper ---------------------------------------


def _fold_bn(w_hwio, b, g, beta, m, v, eps):
    """Fold eval-mode BatchNorm into conv weights/bias (per out-channel)."""
    s = g / jnp.sqrt(v + eps)                                # (Cout,)
    return w_hwio * s, beta + (b - m) * s


def _band_matrix(w_dy, width):
    """Banded width-convolution matrix for one dy tap row.

    w_dy: (3, Ci, Co).  Returns M of shape (width*Ci, width*Co) with
    M[w_in*Ci + ci, w_out*Co + co] = w_dy[w_in - w_out + 1, ci, co]
    when the tap index is in [0, 2] (zero otherwise), i.e. "same" padding
    along the width is folded into the matrix.
    """
    _, Ci, Co = w_dy.shape
    w_in = jnp.arange(width)[:, None]
    w_out = jnp.arange(width)[None, :]
    dx = w_in - w_out + 1                                    # (width, width)
    valid = (dx >= 0) & (dx <= 2)
    blocks = jnp.where(valid[:, :, None, None],
                       w_dy[jnp.clip(dx, 0, 2)], 0.0)        # (win, wout, Ci, Co)
    return blocks.transpose(0, 2, 1, 3).reshape(width * Ci, width * Co)


def _band_weights(w_hwio, width):
    """Stack the 3 per-dy banded matrices: (3, width*Ci, width*Co)."""
    return jnp.stack([_band_matrix(w_hwio[dy], width) for dy in range(3)])


def shallow_cnn_forward(x_nchw, p, eps=1e-5, images_per_step=None):
    """Fused ShallowCNN forward. NCHW in / NCHW out (matches PyTorch)."""
    N, Cin, H, W = x_nchw.shape
    C = p["w1"].shape[-1]
    assert H % 4 == 0 and W % 4 == 0
    Hh, Wh, Hq, Wq = H // 2, W // 2, H // 4, W // 4

    # Default: 2 grid steps when N is even (keeps both v7x TensorCores busy),
    # otherwise a single step with the whole batch (fewest steps on v5e/v6e).
    if images_per_step is None:
        images_per_step = N // 2 if (N % 2 == 0 and N >= 2) else N
    ips = max(1, images_per_step)
    assert N % ips == 0
    steps = N // ips

    # NCHW -> NHWC -> height-pad by 1 -> lane-dense (N, H+2, W*Cin).
    x = jnp.transpose(x_nchw, (0, 2, 3, 1)).astype(jnp.float32)
    x = jnp.pad(x, ((0, 0), (1, 1), (0, 0), (0, 0)))
    x = x.reshape(N, H + 2, W * Cin)

    # Fold BN, build banded bf16 weights and W-tiled f32 biases (one-time).
    w1f, b1f = _fold_bn(p["w1"], p["b1"], p["g1"], p["beta1"], p["m1"], p["v1"], eps)
    w2f, b2f = _fold_bn(p["w2"], p["b2"], p["g2"], p["beta2"], p["m2"], p["v2"], eps)
    w1b = _band_weights(w1f, W).astype(jnp.bfloat16)         # (3, W*Cin, W*C)
    w2b = _band_weights(w2f, Wh).astype(jnp.bfloat16)        # (3, Wh*C, Wh*C)
    b1t = jnp.tile(b1f, (W,)).reshape(1, W * C).astype(jnp.float32)
    b2t = jnp.tile(b2f, (Wh,)).reshape(1, Wh * C).astype(jnp.float32)

    kernel = _make_kernel(ips, H, W, Cin, C)
    out = pl.pallas_call(
        kernel,
        out_shape=jax.ShapeDtypeStruct((N, Hq, Wq * C), jnp.float32),
        grid=(steps,),
        in_specs=[
            pl.BlockSpec((ips, H + 2, W * Cin), lambda g: (g, 0, 0)),
            pl.BlockSpec((3, W * Cin, W * C), lambda g: (0, 0, 0)),
            pl.BlockSpec((1, W * C), lambda g: (0, 0)),
            pl.BlockSpec((3, Wh * C, Wh * C), lambda g: (0, 0, 0)),
            pl.BlockSpec((1, Wh * C), lambda g: (0, 0)),
        ],
        out_specs=pl.BlockSpec((ips, Hq, Wq * C), lambda g: (g, 0, 0)),
        scratch_shapes=[pltpu.VMEM((ips, Hh + 2, Wh * C), jnp.float32)],
        compiler_params=pltpu.CompilerParams(
            dimension_semantics=("parallel",),
            vmem_limit_bytes=32 * 1024 * 1024),
    )(x, w1b, b1t, w2b, b2t)

    # (N, Hq, Wq*C) -> NCHW
    return jnp.transpose(out.reshape(N, Hq, Wq, C), (0, 3, 1, 2))


# ----------------------------- reference & demo ------------------------------


def shallow_cnn_reference(x_nchw, p, eps=1e-5):
    """Pure-JAX (XLA) reference, eval-mode BN, for numerical validation."""
    x = jnp.transpose(x_nchw, (0, 2, 3, 1)).astype(jnp.float32)

    def block(x, w, b, g, beta, m, v):
        y = jax.lax.conv_general_dilated(
            x, w, window_strides=(1, 1), padding="SAME",
            dimension_numbers=("NHWC", "HWIO", "NHWC")) + b
        y = (y - m) / jnp.sqrt(v + eps) * g + beta
        y = jnp.maximum(y, 0.0)
        y = jax.lax.reduce_window(y, -jnp.inf, jax.lax.max,
                                  (1, 2, 2, 1), (1, 2, 2, 1), "VALID")
        return y

    y = block(x, p["w1"], p["b1"], p["g1"], p["beta1"], p["m1"], p["v1"])
    y = block(y, p["w2"], p["b2"], p["g2"], p["beta2"], p["m2"], p["v2"])
    return jnp.transpose(y, (0, 3, 1, 2))


def _conv_init(key, cin, cout):
    # Deterministic PyTorch-style kaiming-uniform-ish init (synthetic weights).
    bound = 1.0 / (cin * 9) ** 0.5
    kw, kb = jax.random.split(key)
    w = jax.random.uniform(kw, (3, 3, cin, cout), jnp.float32, -bound, bound)
    b = jax.random.uniform(kb, (cout,), jnp.float32, -bound, bound)
    return w, b


if __name__ == "__main__":
    key = jax.random.PRNGKey(0)
    k_x, k_w1, k_w2 = jax.random.split(key, 3)

    N, Cin, Cout, H, W = 2, 4, 8, 16, 16
    x = jax.random.normal(k_x, (N, Cin, H, W), jnp.float32)

    w1, b1 = _conv_init(k_w1, Cin, Cout)
    w2, b2 = _conv_init(k_w2, Cout, Cout)
    params = dict(
        w1=w1, b1=b1,
        g1=jnp.ones((Cout,), jnp.float32), beta1=jnp.zeros((Cout,), jnp.float32),
        m1=jnp.zeros((Cout,), jnp.float32), v1=jnp.ones((Cout,), jnp.float32),
        w2=w2, b2=b2,
        g2=jnp.ones((Cout,), jnp.float32), beta2=jnp.zeros((Cout,), jnp.float32),
        m2=jnp.zeros((Cout,), jnp.float32), v2=jnp.ones((Cout,), jnp.float32),
    )

    out = shallow_cnn_forward(x, params)
    out = jax.block_until_ready(out)
    assert out.shape == (N, Cout, H // 4, W // 4), out.shape
    assert bool(jnp.all(jnp.isfinite(out)))

    ref = shallow_cnn_reference(x, params)
    ref = jax.block_until_ready(ref)
    assert bool(jnp.allclose(out, ref, rtol=5e-2, atol=2e-2)), \
        float(jnp.max(jnp.abs(out - ref)))

    print("KERNEL_OK")
</pallas_src>

<mosaic_0001>
module attributes {stable_mosaic.version = 11 : i64} {
  func.func @kernel(%arg0: i32, %arg1: memref<1x18x64xf32, #tpu.memory_space<vmem>>, %arg2: memref<3x64x128xbf16, #tpu.memory_space<vmem>>, %arg3: memref<1x128xf32, #tpu.memory_space<vmem>>, %arg4: memref<3x64x64xbf16, #tpu.memory_space<vmem>>, %arg5: memref<1x64xf32, #tpu.memory_space<vmem>>, %arg6: memref<1x4x32xf32, #tpu.memory_space<vmem>>, %arg7: memref<1x10x64xf32, #tpu.memory_space<vmem>>) attributes {dimension_semantics = [#tpu.dimension_semantics<parallel>], iteration_bounds = array<i64: 2>, scalar_prefetch = 0 : i64, scratch_operands = 1 : i64, tpu.core_type = #tpu.core_type<tc>, window_params = [{transform_indices = @transform_0, window_bounds = array<i64: 1, 18, 64>}, {pipeline_mode = #tpu.pipeline_mode<synchronous>, transform_indices = @transform_1, window_bounds = array<i64: 3, 64, 128>}, {pipeline_mode = #tpu.pipeline_mode<synchronous>, transform_indices = @transform_2, window_bounds = array<i64: 1, 128>}, {pipeline_mode = #tpu.pipeline_mode<synchronous>, transform_indices = @transform_3, window_bounds = array<i64: 3, 64, 64>}, {pipeline_mode = #tpu.pipeline_mode<synchronous>, transform_indices = @transform_4, window_bounds = array<i64: 1, 64>}, {transform_indices = @transform_5, window_bounds = array<i64: 1, 4, 32>}]} {
    %cst = arith.constant 0.000000e+00 : f32
    %0 = vector.broadcast %cst : f32 to vector<16x128xf32>
    %c0 = arith.constant 0 : index
    %c0_0 = arith.constant 0 : index
    %c0_1 = arith.constant 0 : index
    %1 = vector.load %arg1[%c0, %c0_0, %c0_1] : memref<1x18x64xf32, #tpu.memory_space<vmem>>, vector<1x16x64xf32>
    %2 = vector.shape_cast %1 : vector<1x16x64xf32> to vector<16x64xf32>
    %3 = arith.truncf %2 : vector<16x64xf32> to vector<16x64xbf16>
    %c0_2 = arith.constant 0 : index
    %c0_3 = arith.constant 0 : index
    %c0_4 = arith.constant 0 : index
    %4 = vector.load %arg2[%c0_2, %c0_3, %c0_4] : memref<3x64x128xbf16, #tpu.memory_space<vmem>>, vector<1x64x128xbf16>
    %5 = vector.shape_cast %4 : vector<1x64x128xbf16> to vector<64x128xbf16>
    %cst_5 = arith.constant dense<0.000000e+00> : vector<16x128xf32>
    %6 = tpu.matmul %3, %5, %cst_5 {dimension_numbers = #tpu.dot_dimension_numbers<[1], [0], [0], [1], [0, 0, 1, 1], [], []>} : vector<16x64xbf16>, vector<64x128xbf16>, vector<16x128xf32> -> vector<16x128xf32>
    %7 = arith.addf %0, %6 : vector<16x128xf32>
    %c0_6 = arith.constant 0 : index
    %c1 = arith.constant 1 : index
    %c0_7 = arith.constant 0 : index
    %8 = vector.load %arg1[%c0_6, %c1, %c0_7] : memref<1x18x64xf32, #tpu.memory_space<vmem>>, vector<1x16x64xf32>
    %9 = vector.shape_cast %8 : vector<1x16x64xf32> to vector<16x64xf32>
    %10 = arith.truncf %9 : vector<16x64xf32> to vector<16x64xbf16>
    %c1_8 = arith.constant 1 : index
    %c0_9 = arith.constant 0 : index
    %c0_10 = arith.constant 0 : index
    %11 = vector.load %arg2[%c1_8, %c0_9, %c0_10] : memref<3x64x128xbf16, #tpu.memory_space<vmem>>, vector<1x64x128xbf16>
    %12 = vector.shape_cast %11 : vector<1x64x128xbf16> to vector<64x128xbf16>
    %cst_11 = arith.constant dense<0.000000e+00> : vector<16x128xf32>
    %13 = tpu.matmul %10, %12, %cst_11 {dimension_numbers = #tpu.dot_dimension_numbers<[1], [0], [0], [1], [0, 0, 1, 1], [], []>} : vector<16x64xbf16>, vector<64x128xbf16>, vector<16x128xf32> -> vector<16x128xf32>
    %14 = arith.addf %7, %13 : vector<16x128xf32>
    %c0_12 = arith.constant 0 : index
    %c2 = arith.constant 2 : index
    %c0_13 = arith.constant 0 : index
    %15 = vector.load %arg1[%c0_12, %c2, %c0_13] : memref<1x18x64xf32, #tpu.memory_space<vmem>>, vector<1x16x64xf32>
    %16 = vector.shape_cast %15 : vector<1x16x64xf32> to vector<16x64xf32>
    %17 = arith.truncf %16 : vector<16x64xf32> to vector<16x64xbf16>
    %c2_14 = arith.constant 2 : index
    %c0_15 = arith.constant 0 : index
    %c0_16 = arith.constant 0 : index
    %18 = vector.load %arg2[%c2_14, %c0_15, %c0_16] : memref<3x64x128xbf16, #tpu.memory_space<vmem>>, vector<1x64x128xbf16>
    %19 = vector.shape_cast %18 : vector<1x64x128xbf16> to vector<64x128xbf16>
    %cst_17 = arith.constant dense<0.000000e+00> : vector<16x128xf32>
    %20 = tpu.matmul %17, %19, %cst_17 {dimension_numbers = #tpu.dot_dimension_numbers<[1], [0], [0], [1], [0, 0, 1, 1], [], []>} : vector<16x64xbf16>, vector<64x128xbf16>, vector<16x128xf32> -> vector<16x128xf32>
    %21 = arith.addf %14, %20 : vector<16x128xf32>
    %c0_18 = arith.constant 0 : index
    %c0_19 = arith.constant 0 : index
    %22 = vector.load %arg3[%c0_18, %c0_19] : memref<1x128xf32, #tpu.memory_space<vmem>>, vector<1x128xf32>
    %23 = vector.broadcast %22 : vector<1x128xf32> to vector<16x128xf32>
    %24 = arith.addf %21, %23 : vector<16x128xf32>
    %cst_20 = arith.constant 0.000000e+00 : f32
    %25 = vector.broadcast %cst_20 : f32 to vector<16x128xf32>
    %26 = arith.maximumf %24, %25 : vector<16x128xf32>
    %27 = vector.shape_cast %26 : vector<16x128xf32> to vector<8x2x128xf32>
    %28 = vector.extract_strided_slice %27 {offsets = [0, 0, 0], sizes = [8, 1, 128], strides = [1, 1, 1]} : vector<8x2x128xf32> to vector<8x1x128xf32>
    %29 = vector.shape_cast %28 : vector<8x1x128xf32> to vector<8x128xf32>
    %30 = vector.extract_strided_slice %27 {offsets = [0, 1, 0], sizes = [8, 1, 128], strides = [1, 1, 1]} : vector<8x2x128xf32> to vector<8x1x128xf32>
    %31 = vector.shape_cast %30 : vector<8x1x128xf32> to vector<8x128xf32>
    %32 = arith.maximumf %29, %31 : vector<8x128xf32>
    %33 = vector.extract_strided_slice %32 {offsets = [0, 0], sizes = [8, 8], strides = [1, 1]} : vector<8x128xf32> to vector<8x8xf32>
    %34 = vector.extract_strided_slice %32 {offsets = [0, 8], sizes = [8, 8], strides = [1, 1]} : vector<8x128xf32> to vector<8x8xf32>
    %35 = arith.maximumf %33, %34 : vector<8x8xf32>
    %36 = vector.extract_strided_slice %32 {offsets = [0, 16], sizes = [8, 8], strides = [1, 1]} : vector<8x128xf32> to vector<8x8xf32>
    %37 = vector.extract_strided_slice %32 {offsets = [0, 24], sizes = [8, 8], strides = [1, 1]} : vector<8x128xf32> to vector<8x8xf32>
    %38 = arith.maximumf %36, %37 : vector<8x8xf32>
    %39 = vector.extract_strided_slice %32 {offsets = [0, 32], sizes = [8, 8], strides = [1, 1]} : vector<8x128xf32> to vector<8x8xf32>
    %40 = vector.extract_strided_slice %32 {offsets = [0, 40], sizes = [8, 8], strides = [1, 1]} : vector<8x128xf32> to vector<8x8xf32>
    %41 = arith.maximumf %39, %40 : vector<8x8xf32>
    %42 = vector.extract_strided_slice %32 {offsets = [0, 48], sizes = [8, 8], strides = [1, 1]} : vector<8x128xf32> to vector<8x8xf32>
    %43 = vector.extract_strided_slice %32 {offsets = [0, 56], sizes = [8, 8], strides = [1, 1]} : vector<8x128xf32> to vector<8x8xf32>
    %44 = arith.maximumf %42, %43 : vector<8x8xf32>
    %45 = vector.extract_strided_slice %32 {offsets = [0, 64], sizes = [8, 8], strides = [1, 1]} : vector<8x128xf32> to vector<8x8xf32>
    %46 = vector.extract_strided_slice %32 {offsets = [0, 72], sizes = [8, 8], strides = [1, 1]} : vector<8x128xf32> to vector<8x8xf32>
    %47 = arith.maximumf %45, %46 : vector<8x8xf32>
    %48 = vector.extract_strided_slice %32 {offsets = [0, 80], sizes = [8, 8], strides = [1, 1]} : vector<8x128xf32> to vector<8x8xf32>
    %49 = vector.extract_strided_slice %32 {offsets = [0, 88], sizes = [8, 8], strides = [1, 1]} : vector<8x128xf32> to vector<8x8xf32>
    %50 = arith.maximumf %48, %49 : vector<8x8xf32>
    %51 = vector.extract_strided_slice %32 {offsets = [0, 96], sizes = [8, 8], strides = [1, 1]} : vector<8x128xf32> to vector<8x8xf32>
    %52 = vector.extract_strided_slice %32 {offsets = [0, 104], sizes = [8, 8], strides = [1, 1]} : vector<8x128xf32> to vector<8x8xf32>
    %53 = arith.maximumf %51, %52 : vector<8x8xf32>
    %54 = vector.extract_strided_slice %32 {offsets = [0, 112], sizes = [8, 8], strides = [1, 1]} : vector<8x128xf32> to vector<8x8xf32>
    %55 = vector.extract_strided_slice %32 {offsets = [0, 120], sizes = [8, 8], strides = [1, 1]} : vector<8x128xf32> to vector<8x8xf32>
    %56 = arith.maximumf %54, %55 : vector<8x8xf32>
    %57 = tpu.concatenate %35, %38, %41, %44, %47, %50, %53, %56 in 1 : vector<8x8xf32>, vector<8x8xf32>, vector<8x8xf32>, vector<8x8xf32>, vector<8x8xf32>, vector<8x8xf32>, vector<8x8xf32>, vector<8x8xf32> -> vector<8x64xf32>
    %cst_21 = arith.constant 0.000000e+00 : f32
    %58 = vector.broadcast %cst_21 : f32 to vector<1x1x64xf32>
    %c0_22 = arith.constant 0 : index
    %c0_23 = arith.constant 0 : index
    %c0_24 = arith.constant 0 : index
    %59 = vector.load %arg7[%c0_22, %c0_23, %c0_24] : memref<1x10x64xf32, #tpu.memory_space<vmem>>, vector<1x1x64xf32>
    tpu.vector_store %arg7[%c0_22, %c0_23, %c0_24], %58 {strides = array<i32>} : memref<1x10x64xf32, #tpu.memory_space<vmem>>, vector<1x1x64xf32>,
    %c0_25 = arith.constant 0 : index
    %c9 = arith.constant 9 : index
    %c0_26 = arith.constant 0 : index
    %60 = vector.load %arg7[%c0_25, %c9, %c0_26] : memref<1x10x64xf32, #tpu.memory_space<vmem>>, vector<1x1x64xf32>
    tpu.vector_store %arg7[%c0_25, %c9, %c0_26], %58 {strides = array<i32>} : memref<1x10x64xf32, #tpu.memory_space<vmem>>, vector<1x1x64xf32>,
    %61 = vector.shape_cast %57 : vector<8x64xf32> to vector<1x8x64xf32>
    %c0_27 = arith.constant 0 : index
    %c1_28 = arith.constant 1 : index
    %c0_29 = arith.constant 0 : index
    %62 = vector.load %arg7[%c0_27, %c1_28, %c0_29] : memref<1x10x64xf32, #tpu.memory_space<vmem>>, vector<1x8x64xf32>
    tpu.vector_store %arg7[%c0_27, %c1_28, %c0_29], %61 {strides = array<i32>} : memref<1x10x64xf32, #tpu.memory_space<vmem>>, vector<1x8x64xf32>,
    %cst_30 = arith.constant 0.000000e+00 : f32
    %63 = vector.broadcast %cst_30 : f32 to vector<8x64xf32>
    %c0_31 = arith.constant 0 : index
    %c0_32 = arith.constant 0 : index
    %c0_33 = arith.constant 0 : index
    %64 = vector.load %arg7[%c0_31, %c0_32, %c0_33] : memref<1x10x64xf32, #tpu.memory_space<vmem>>, vector<1x8x64xf32>
    %65 = vector.shape_cast %64 : vector<1x8x64xf32> to vector<8x64xf32>
    %66 = arith.truncf %65 : vector<8x64xf32> to vector<8x64xbf16>
    %c0_34 = arith.constant 0 : index
    %c0_35 = arith.constant 0 : index
    %c0_36 = arith.constant 0 : index
    %67 = vector.load %arg4[%c0_34, %c0_35, %c0_36] : memref<3x64x64xbf16, #tpu.memory_space<vmem>>, vector<1x64x64xbf16>
    %68 = vector.shape_cast %67 : vector<1x64x64xbf16> to vector<64x64xbf16>
    %cst_37 = arith.constant dense<0.000000e+00> : vector<8x64xf32>
    %69 = tpu.matmul %66, %68, %cst_37 {dimension_numbers = #tpu.dot_dimension_numbers<[1], [0], [0], [1], [0, 0, 1, 1], [], []>} : vector<8x64xbf16>, vector<64x64xbf16>, vector<8x64xf32> -> vector<8x64xf32>
    %70 = arith.addf %63, %69 : vector<8x64xf32>
    %c0_38 = arith.constant 0 : index
    %c1_39 = arith.constant 1 : index
    %c0_40 = arith.constant 0 : index
    %71 = vector.load %arg7[%c0_38, %c1_39, %c0_40] : memref<1x10x64xf32, #tpu.memory_space<vmem>>, vector<1x8x64xf32>
    %72 = vector.shape_cast %71 : vector<1x8x64xf32> to vector<8x64xf32>
    %73 = arith.truncf %72 : vector<8x64xf32> to vector<8x64xbf16>
    %c1_41 = arith.constant 1 : index
    %c0_42 = arith.constant 0 : index
    %c0_43 = arith.constant 0 : index
    %74 = vector.load %arg4[%c1_41, %c0_42, %c0_43] : memref<3x64x64xbf16, #tpu.memory_space<vmem>>, vector<1x64x64xbf16>
    %75 = vector.shape_cast %74 : vector<1x64x64xbf16> to vector<64x64xbf16>
    %cst_44 = arith.constant dense<0.000000e+00> : vector<8x64xf32>
    %76 = tpu.matmul %73, %75, %cst_44 {dimension_numbers = #tpu.dot_dimension_numbers<[1], [0], [0], [1], [0, 0, 1, 1], [], []>} : vector<8x64xbf16>, vector<64x64xbf16>, vector<8x64xf32> -> vector<8x64xf32>
    %77 = arith.addf %70, %76 : vector<8x64xf32>
    %c0_45 = arith.constant 0 : index
    %c2_46 = arith.constant 2 : index
    %c0_47 = arith.constant 0 : index
    %78 = vector.load %arg7[%c0_45, %c2_46, %c0_47] : memref<1x10x64xf32, #tpu.memory_space<vmem>>, vector<1x8x64xf32>
    %79 = vector.shape_cast %78 : vector<1x8x64xf32> to vector<8x64xf32>
    %80 = arith.truncf %79 : vector<8x64xf32> to vector<8x64xbf16>
    %c2_48 = arith.constant 2 : index
    %c0_49 = arith.constant 0 : index
    %c0_50 = arith.constant 0 : index
    %81 = vector.load %arg4[%c2_48, %c0_49, %c0_50] : memref<3x64x64xbf16, #tpu.memory_space<vmem>>, vector<1x64x64xbf16>
    %82 = vector.shape_cast %81 : vector<1x64x64xbf16> to vector<64x64xbf16>
    %cst_51 = arith.constant dense<0.000000e+00> : vector<8x64xf32>
    %83 = tpu.matmul %80, %82, %cst_51 {dimension_numbers = #tpu.dot_dimension_numbers<[1], [0], [0], [1], [0, 0, 1, 1], [], []>} : vector<8x64xbf16>, vector<64x64xbf16>, vector<8x64xf32> -> vector<8x64xf32>
    %84 = arith.addf %77, %83 : vector<8x64xf32>
    %c0_52 = arith.constant 0 : index
    %c0_53 = arith.constant 0 : index
    %85 = vector.load %arg5[%c0_52, %c0_53] : memref<1x64xf32, #tpu.memory_space<vmem>>, vector<1x64xf32>
    %86 = vector.broadcast %85 : vector<1x64xf32> to vector<8x64xf32>
    %87 = arith.addf %84, %86 : vector<8x64xf32>
    %cst_54 = arith.constant 0.000000e+00 : f32
    %88 = vector.broadcast %cst_54 : f32 to vector<8x64xf32>
    %89 = arith.maximumf %87, %88 : vector<8x64xf32>
    %90 = vector.shape_cast %89 : vector<8x64xf32> to vector<4x2x64xf32>
    %91 = vector.extract_strided_slice %90 {offsets = [0, 0, 0], sizes = [4, 1, 64], strides = [1, 1, 1]} : vector<4x2x64xf32> to vector<4x1x64xf32>
    %92 = vector.shape_cast %91 : vector<4x1x64xf32> to vector<4x64xf32>
    %93 = vector.extract_strided_slice %90 {offsets = [0, 1, 0], sizes = [4, 1, 64], strides = [1, 1, 1]} : vector<4x2x64xf32> to vector<4x1x64xf32>
    %94 = vector.shape_cast %93 : vector<4x1x64xf32> to vector<4x64xf32>
    %95 = arith.maximumf %92, %94 : vector<4x64xf32>
    %96 = vector.extract_strided_slice %95 {offsets = [0, 0], sizes = [4, 8], strides = [1, 1]} : vector<4x64xf32> to vector<4x8xf32>
    %97 = vector.extract_strided_slice %95 {offsets = [0, 8], sizes = [4, 8], strides = [1, 1]} : vector<4x64xf32> to vector<4x8xf32>
    %98 = arith.maximumf %96, %97 : vector<4x8xf32>
    %99 = vector.extract_strided_slice %95 {offsets = [0, 16], sizes = [4, 8], strides = [1, 1]} : vector<4x64xf32> to vector<4x8xf32>
    %100 = vector.extract_strided_slice %95 {offsets = [0, 24], sizes = [4, 8], strides = [1, 1]} : vector<4x64xf32> to vector<4x8xf32>
    %101 = arith.maximumf %99, %100 : vector<4x8xf32>
    %102 = vector.extract_strided_slice %95 {offsets = [0, 32], sizes = [4, 8], strides = [1, 1]} : vector<4x64xf32> to vector<4x8xf32>
    %103 = vector.extract_strided_slice %95 {offsets = [0, 40], sizes = [4, 8], strides = [1, 1]} : vector<4x64xf32> to vector<4x8xf32>
    %104 = arith.maximumf %102, %103 : vector<4x8xf32>
    %105 = vector.extract_strided_slice %95 {offsets = [0, 48], sizes = [4, 8], strides = [1, 1]} : vector<4x64xf32> to vector<4x8xf32>
    %106 = vector.extract_strided_slice %95 {offsets = [0, 56], sizes = [4, 8], strides = [1, 1]} : vector<4x64xf32> to vector<4x8xf32>
    %107 = arith.maximumf %105, %106 : vector<4x8xf32>
    %108 = tpu.concatenate %98, %101, %104, %107 in 1 : vector<4x8xf32>, vector<4x8xf32>, vector<4x8xf32>, vector<4x8xf32> -> vector<4x32xf32>
    %109 = vector.shape_cast %108 : vector<4x32xf32> to vector<1x4x32xf32>
    %c0_55 = arith.constant 0 : index
    %c0_56 = arith.constant 0 : index
    %c0_57 = arith.constant 0 : index
    %110 = vector.load %arg6[%c0_55, %c0_56, %c0_57] : memref<1x4x32xf32, #tpu.memory_space<vmem>>, vector<1x4x32xf32>
    tpu.vector_store %arg6[%c0_55, %c0_56, %c0_57], %109 {strides = array<i32>} : memref<1x4x32xf32, #tpu.memory_space<vmem>>, vector<1x4x32xf32>,
    return
  }
  func.func @transform_0(%arg0: i32) -> (i32, i32, i32) {
    %c0_i32 = arith.constant 0 : i32
    %c0_i32_0 = arith.constant 0 : i32
    %c0_i32_1 = arith.constant 0 : i32
    return %arg0, %c0_i32, %c0_i32_0 : i32, i32, i32
  }
  func.func @transform_1(%arg0: i32) -> (i32, i32, i32) {
    %c0_i32 = arith.constant 0 : i32
    %c0_i32_0 = arith.constant 0 : i32
    %c0_i32_1 = arith.constant 0 : i32
    %c0_i32_2 = arith.constant 0 : i32
    return %c0_i32, %c0_i32_0, %c0_i32_1 : i32, i32, i32
  }
  func.func @transform_2(%arg0: i32) -> (i32, i32) {
    %c0_i32 = arith.constant 0 : i32
    %c0_i32_0 = arith.constant 0 : i32
    %c0_i32_1 = arith.constant 0 : i32
    return %c0_i32, %c0_i32_0 : i32, i32
  }
  func.func @transform_3(%arg0: i32) -> (i32, i32, i32) {
    %c0_i32 = arith.constant 0 : i32
    %c0_i32_0 = arith.constant 0 : i32
    %c0_i32_1 = arith.constant 0 : i32
    %c0_i32_2 = arith.constant 0 : i32
    return %c0_i32, %c0_i32_0, %c0_i32_1 : i32, i32, i32
  }
  func.func @transform_4(%arg0: i32) -> (i32, i32) {
    %c0_i32 = arith.constant 0 : i32
    %c0_i32_0 = arith.constant 0 : i32
    %c0_i32_1 = arith.constant 0 : i32
    return %c0_i32, %c0_i32_0 : i32, i32
  }
  func.func @transform_5(%arg0: i32) -> (i32, i32, i32) {
    %c0_i32 = arith.constant 0 : i32
    %c0_i32_0 = arith.constant 0 : i32
    %c0_i32_1 = arith.constant 0 : i32
    return %arg0, %c0_i32, %c0_i32_0 : i32, i32, i32
  }
}

</mosaic_0001>

<bundles_post_ra>
// kernel: tpu_custom_call.1
= control target key start
LH: loop header
LB: loop body
LE: loop exit
PB: predicated region body
PF: predicated region fallthrough
CT: control target
= control target key end

     0   :  { %10 = vsyncpa [#allocation4], 0  ;;  %s1864_s0 = inlined_call_operand.vmem [shape: f32[2,18,64], index: 0, kind: input, shape index: {}]   ;;  %s1865_s1 = inlined_call_operand.hbm [shape: bf16[3,64,128], index: 1, kind: input, shape index: {}]   ;;  %s1866_s2 = inlined_call_operand.vmem [shape: f32[1,128], index: 2, kind: input, shape index: {}]   ;;  %s1867_s3 = inlined_call_operand.hbm [shape: bf16[3,64,64], index: 3, kind: input, shape index: {}]   ;;  %s1868_s4 = inlined_call_operand.vmem [shape: f32[1,64], index: 4, kind: input, shape index: {}]   ;;  %s1869_s5 = inlined_call_operand.hbm [shape: f32[2,4,32], index: 5, kind: output, shape index: {}]  }
   0x1   :  { %11 = vsyncpa [#allocation7], 0 }
   0x2   :  { %12 = vsyncpa [#allocation5], 0 }
   0x3   :  { %14 = vsyncpa [#allocation5 + $0x1], 0  ;;  %s1581_s18 = smov 0   ;;  %s1583_s19 = smov 0  }
   0x4   :  { %s1585_s20 = smov 0   ;;  %s1587_s21 = smov 0  }
   0x5 LB: > { %s1602_s22 = sadd.s32 4294967295, %s1534_s21   ;;  %s1151_s23 = sadd.s32 4294967294, %s1534_s21   ;;  %s1534_s21 = sphi %s1587_s21, %s1887_s21   ;;  %s1530_s20 = sphi %s1585_s20, %s1886_s20   ;;  %s1526_s19 = sphi %s1583_s19, %s1885_s19   ;;  %s1522_s18 = sphi %s1581_s18, %s1884_s18  }
   0x6   : > { %s1606_s24 = sadd.s32 1, %s1534_s21   ;;  %s137_s25 = sadd.s32 1, %s1530_s20 }
   0x7   : > { %s134_s26 = ssub.s32 %s1534_s21, %s1606_s24  ;;  %p147_p0 = scmp.ne.s32.totalorder %s1530_s20, %s1526_s19 }
   0x8   : > { %p135_p1 = scmp.eq.s32.totalorder %s134_s26, 0  ;;  %p148_p2 = scmp.eq.s32.totalorder %s1602_s22, 1 }
   0x9   : > { %p153_p3 = scmp.ne.s32.totalorder %s1526_s19, %s1522_s18  ;;  %p154_p4 = scmp.eq.s32.totalorder %s1151_s23, 1 }
   0xa   : > { %s1617_s27 = scalar_select %p135_p1, %s1530_s20, %s137_s25  }
   0xb   : > { %p1619_p5 = por %p148_p2, %p147_p0  ;;  %p1623_p6 = por %p154_p4, %p153_p3 }
   0xc   : > { %p1152_p7 = scmp.ge.s32.totalorder %s1534_s21, 1  ;;  %p161_p8 = scmp.lt.s32.totalorder %s1534_s21, 3 }
   0xd   : > { %s1873_s28 = scalar_select %p1619_p5, 1, 0 }
   0xe   : > { %s1874_s29 = scalar_select %p1623_p6, 1, 0 }
   0xf   : > { %p1870_p9 = scmp.eq.s32.totalorder %s1602_s22, 0  ;;  %p1630_p10 = pnand %p1152_p7, %p161_p8 }
  0x10   : > { %s1536_s6 = smov [#allocation3]   ;;  %s1537_s9 = smov [#allocation6]  }
  0x11   : > { %s1875_s30 = scalar_select %p1630_p10, 1, 0 }
  0x12   : > { %s173_s7 = sshll.u32 %s1536_s6, 4  ;;  %p1322_p11 = pneg %p1630_p10  ;;  %s174_s7 = int_to_ptr.vmem [resolvable:$true] %s173_s7 }
  0x13   : > { %s189_s10 = sshll.u32 %s1537_s9, 4  ;;  %s1408_s13 = scalar_lea.hbm %s1865_s1, 1536  ;;  %s1642_s10 = int_to_ptr.vmem [resolvable:$true] %s189_s10 }
  0x14   : > { %p1638_p12 = pnand %p1870_p9, %p1322_p11  ;;  %p1409_p13 = scmp.ne.s32.totalorder %s1865_s1, %s1408_s13 }
  0x15   : > { %p1415_p3 = scmp.lt.u32.totalorder %s1408_s13, %s1865_s1 }
  0x16   : > { %p1410_p0 = pneg %p1638_p12 }
  0x18   : > { %p1411_p1 = pnand %p1410_p0, %p1409_p13 }
  0x1a   : > { %p1412_p2 = pneg %p1411_p1 }
  0x1c   : > { %p1417_p4 = pnand %p1415_p3, %p1412_p2 }
  0x1e   : > { %1420 = shalt.err (!%p1417_p4)
}
  0x1f   : > { %s1421_s23 = scalar_lea.vmem %s174_s7, 1536  ;;  %p1429_p9 = scmp.lt.s32.totalorder %s174_s7, %s174_s7 }
  0x20   : > { %p1422_p7 = scmp.ne.s32.totalorder %s174_s7, %s1421_s23  ;;  %p1430_p6 = scmp.lt.s32.totalorder %s1421_s23, %s1421_s23 }
  0x22   : > { %p1424_p8 = pnand %p1422_p7, %p1410_p0  ;;  %p1431_p5 = por %p1430_p6, %p1429_p9 }
  0x24   : > { %p1425_p11 = pneg %p1424_p8 }
  0x26   : > { %p1432_p10 = pnand %p1431_p5, %p1425_p11 }
  0x28   : > { %1435 = shalt.err (!%p1432_p10)
}
  0x29   : > { %s1538_s25 = smov 64   ;;  %s1539_s26 = smov 4  }
  0x2a   : > { %1325 = dma.hbm_to_vmem [thread:$0]  (!%p1638_p12), %s1865_s1, 1536, %s174_s7, [#allocation4], %s1538_s25, %s1538_s25, %s1539_s26  }
  0x2b   : > { %s1436_s13 = scalar_lea.hbm %s1867_s3, 1536 }
  0x2c   : > { %p1437_p13 = scmp.ne.s32.totalorder %s1867_s3, %s1436_s13  ;;  %p1443_p9 = scmp.lt.u32.totalorder %s1436_s13, %s1867_s3 }
  0x2e   : > { %p1439_p5 = pnand %p1437_p13, %p1410_p0 }
  0x30   : > { %p1440_p6 = pneg %p1439_p5 }
  0x32   : > { %p1445_p10 = pnand %p1443_p9, %p1440_p6 }
  0x34   : > { %1448 = shalt.err (!%p1445_p10)
}
  0x35   : > { %s1449_s7 = scalar_lea.vmem %s1642_s10, 1536  ;;  %p1457_p4 = scmp.lt.s32.totalorder %s1642_s10, %s1642_s10 }
  0x36   : > { %p1450_p1 = scmp.ne.s32.totalorder %s1642_s10, %s1449_s7  ;;  %p1458_p7 = scmp.lt.s32.totalorder %s1449_s7, %s1449_s7 }
  0x38   : > { %p1452_p2 = pnand %p1450_p1, %p1410_p0  ;;  %p1459_p8 = por %p1458_p7, %p1457_p4 }
  0x3a   : > { %p1453_p3 = pneg %p1452_p2 }
  0x3c   : > { %p1460_p11 = pnand %p1459_p8, %p1453_p3 }
  0x3e   : > { %1463 = shalt.err (!%p1460_p11)
}
  0x3f   : > { %1328 = dma.hbm_to_vmem [thread:$0]  (!%p1638_p12), %s1867_s3, 1536, %s1642_s10, [#allocation7], %s1538_s25, %s1538_s25, %s1539_s26  }
  0x40   : > { %p1877_p13 = scmp.ne.s32.totalorder %s1875_s30, 0 }
  0x41   : > { %p1878_p5 = scmp.eq.s32.totalorder (!%p1877_p13), %s1602_s22, 0 }
  0x42   : > { %216 = sbr.rel (%p1877_p13) target bundleno = 1108 (0x454), region = 40 }
  0x49   : > { %1509 = dma.done.wait (%p1878_p5), [#allocation4], 1536   ;;  %p1879_p0 = pmov %p1878_p5 }
  0x4b   : > { %1511 = vsyncadd (%p1879_p0), [#allocation4], 4294965760  ;;  %p1880_p6 = pmov %p1879_p0 }
  0x4c   : > { %p1881_p9 = pmov %p1879_p0 }
  0x4d   : > { %1513 = dma.done.wait (%p1880_p6), [#allocation7], 1536  }
  0x4e   : > { %1515 = vsyncadd (%p1881_p9), [#allocation7], 4294965760  ;;  %p248_p10 = scmp.lt.s32.totalorder %s1602_s22, 1  ;;  %v1540_v0 = vmov 0.0   ;;  %vm1541_vm0 = vmmov 0   ;;  %v1384_v1 = vld [vmem:[#allocation3 + $0x20] sm:$0xff]   ;;  %v513_v34 = vlaneseq }
  0x4f   : > { %1239 = vmatprep.subr.bf16.mxu0 %v1540_v0  ;;  %1251 = vmatprep.subr.bf16.mxu1 %v1540_v0  ;;  %v1385_v2 = vld [vmem:[#allocation3] sm:$0xff]   ;;  %v1386_v3 = vld [vmem:[#allocation3 + $0x28] sm:$0xff]   ;;  %v1388_v5 = vld [vmem:[#allocation3 + $0x30] sm:$0xff]   ;;  %vm301_vm1 = vcmask 523264   ;;  %v1542_v32 = vmov 1983009808  }
  0x50   : > { %1247 = vmatprep.mubr.msk.bf16.mxu0 %vm1541_vm0, %v1540_v0  ;;  %1259 = vmatprep.mubr.msk.bf16.mxu1 %vm1541_vm0, %v1540_v0  ;;  %s249_s30 = scalar_select %p248_p10, %s1602_s22, 1  ;;  %v1387_v4 = vld [vmem:[#allocation3 + $0x8] sm:$0xff]   ;;  %v1389_v6 = vld [vmem:[#allocation3 + $0x10] sm:$0xff]   ;;  %v1390_v7 = vld [vmem:[#allocation3 + $0x38] sm:$0xff]   ;;  %v511_v33 = vunpack.c.l.s4 %v1542_v32  ;;  %v514_v36 = vshrl.u32 %v513_v34, 7  ;;  %vm663_vm2 = vcmask 1041409  }
  0x51   : > { %1240 = vmatpush3.bf16.msra.mxu0 %v1384_v1  ;;  %1252 = vmatpush3.bf16.msra.mxu1 %v1385_v2  ;;  %v1391_v9 = vld [vmem:[#allocation3 + $0x18] sm:$0xff]   ;;  %v1392_v14 = vld [vmem:[#allocation3 + $0x40] sm:$0xff]   ;;  %v1393_v16 = vld [vmem:[#allocation3 + $0x48] sm:$0xff]   ;;  %s1543_s12 = smov 120   ;;  %vm665_vm3 = vcmask 1042434   ;;  %vm667_vm4 = vcmask 1043459  }
  0x52   : > { %s1311_s8 = smul.u32 24, %s249_s30  ;;  %1241 = vmatprep.subr.bf16.mxu0 %v1540_v0  ;;  %1253 = vmatprep.subr.bf16.mxu1 %v1540_v0  ;;  %v1394_v17 = vld [vmem:[#allocation3 + $0x50] sm:$0xff]   ;;  %v1395_v18 = vld [vmem:[#allocation3 + $0x58] sm:$0xff]   ;;  %v512_v35 = vunpack.c.0.s8 %v511_v33  ;;  %vm669_vm5 = vcmask 1044484   ;;  %v1396_v33 = vld [vmem:[#allocation6 + $0x20] sm:$0xff]   ;;  %vm671_vm6 = vcmask 1045509  }
  0x53   : > { %v1176_v38 = vld [vmem:[%s1866_s2] ss:$0 sm:$0xff]  ;;  %vm673_vm7 = vcmask 1046534   ;;  %vm675_vm8 = vcmask 1047559   ;;  %s1544_s13 = smov 112   ;;  %vm713_vm9 = vcmask 516096  }
  0x54   : > { %s1714_s26 = scalar_lea.vmem %s1864_s0, %s1311_s8  ;;  %v1744_v43 = vsub.s32 %v512_v35, %v514_v36  ;;  %714 = vst.msk [vmem:[#allocation2] sm:$0x1] %vm713_vm9, %v1540_v0  ;;  %715 = vst.msk [vmem:[#allocation2 + $0x9] sm:$0x1] %vm713_vm9, %v1540_v0  ;;  %s1545_s14 = smov 96   ;;  %vm699_vm10 = vcmask 64512  }
  0x55   : > { %1242 = vmatpush3.bf16.msra.mxu0 %v1386_v3  ;;  %1254 = vmatpush3.bf16.msra.mxu1 %v1387_v4  ;;  %v265_v8 = vld [vmem:[%s1714_s26 + $0x1] sm:$0xff]  ;;  %v266_v10 = vld [vmem:[%s1714_s26 + $0x9] sm:$0xff]  ;;  %s1546_s15 = smov 104   ;;  %s1547_s16 = smov 80   ;;  %vm701_vm11 = vcmask 130048   ;;  %vm703_vm12 = vcmask 195584  }
  0x56   : > { %1243 = vmatprep.subr.bf16.mxu0 %v1540_v0  ;;  %1255 = vmatprep.subr.bf16.mxu1 %v1540_v0  ;;  %v254_v11 = vld [vmem:[%s1714_s26] sm:$0xff]  ;;  %v255_v12 = vld [vmem:[%s1714_s26 + $0x8] sm:$0xff]  ;;  %v267_v13 = vpack.c.bf16 %v266_v10, %v265_v8  ;;  %s1548_s17 = smov 88   ;;  %s1549_s7 = smov 72   ;;  %vm705_vm13 = vcmask 261120   ;;  %vm707_vm14 = vcmask 326656  }
  0x57   : > { %v256_v15 = vpack.c.bf16 %v255_v12, %v254_v11  ;;  %v414_v19 = vld [vmem:[%s1714_s26 + $0x2] sm:$0xff]  ;;  %v415_v20 = vld [vmem:[%s1714_s26 + $0xa] sm:$0xff]  ;;  %vm709_vm15 = vcmask 392192   ;;  %s245_s30 = sand.u32 1, %s1526_s19   ;;  %s1206_s10 = sshll.u32 %s1602_s22, 6 }
  0x58   : > { %v416_v21 = vpack.c.bf16 %v415_v20, %v414_v19  ;;  %s1159_s8 = sshll.u32 %s245_s30, 2  ;;  %s1057_s22 = scalar_lea.sflag [#allocation5], %s245_s30 }
  0x59   : > { %1244 = vmatpush3.bf16.msra.mxu0 %v1388_v5  ;;  %1256 = vmatpush3.bf16.msra.mxu1 %v1389_v6  ;;  %s247_s25 = scalar_lea.vmem [#allocation8], %s1159_s8  ;;  %p1882_p1 = scmp.ne.s32.totalorder %s1873_s28, 0 }
  0x5a   : > { %1245 = vmatprep.subr.bf16.mxu0 %v1540_v0  ;;  %1257 = vmatprep.subr.bf16.mxu1 %v1540_v0  ;;  %s1070_s26 = sshll.u32 %s247_s25, 4  ;;  %s1823_s26 = int_to_ptr.vmem [resolvable:$true] %s1070_s26 }
  0x5d   : > { %1246 = vmatpush3.bf16.msra.mxu0 %v1390_v7  ;;  %1258 = vmatpush3.bf16.msra.mxu1 %v1391_v9 }
  0x5e   : > { %1263 = vmatprep.subr.bf16.mxu0 %v1540_v0  ;;  %1275 = vmatprep.subr.bf16.mxu1 %v1540_v0 }
  0x60   : > { %1248 = vmatmul.mubr.msk.bf16.vlgmr.msra.gmra.mrb[0].mxu0 %vm301_vm1, %v267_v13  ;;  %1260 = vmatmul.mubr.msk.bf16.vlgmr.msra.gmra.mrb[0].mxu1 %vm301_vm1, %v256_v15 }
  0x61   : > { %1264 = vmatpush3.bf16.msra.mxu0 %v1392_v14  ;;  %1271 = vmatprep.mubr.msk.bf16.mxu0 %vm1541_vm0, %v1540_v0  ;;  %v1758_v14 = vsub.s32 0, %v514_v36 }
  0x62   : > { %1265 = vmatprep.subr.bf16.mxu0 %v1540_v0  ;;  %1283 = vmatprep.mubr.msk.bf16.mxu1 %vm1541_vm0, %v1540_v0 }
  0x63   : > { %1276 = vmatpush3.bf16.msra.mxu1 %v1396_v33 }
  0x64   : > { %1277 = vmatprep.subr.bf16.mxu1 %v1540_v0 }
  0x65   : > { %1266 = vmatpush3.bf16.msra.mxu0 %v1393_v16 }
  0x66   : > { %1267 = vmatprep.subr.bf16.mxu0 %v1540_v0 }
  0x69   : > { %1268 = vmatpush3.bf16.msra.mxu0 %v1394_v17 }
  0x6a   : > { %1269 = vmatprep.subr.bf16.mxu0 %v1540_v0 }
  0x6d   : > { %1270 = vmatpush3.bf16.msra.mxu0 %v1395_v18 }
  0x6e   : > { %1287 = vmatprep.subr.bf16.mxu0 %v1540_v0 }
  0x70   : > { %1272 = vmatmul.mubr.msk.bf16.vlgmr.msra.gmra.mrb[4].mxu0 %vm301_vm1, %v416_v21 }
  0x71   : > { %1295 = vmatprep.mubr.msk.bf16.mxu0 %vm1541_vm0, %v1540_v0 }
 0x133   : > { %v339_v22 = vpop.f32.mrb[0].mxu0  ;;  %v407_v23 = vpop.f32.mrb[0].mxu1 }
 0x134   : > { %v1249_v24 = vpop.f32.mrb[1].mxu0  ;;  %v408_v25 = vadd.f32 %v407_v23, %v339_v22  ;;  %v1261_v26 = vpop.f32.mrb[1].mxu1 }
 0x135   : > { %v342_v27 = vpop.f32.mrb[2].mxu0  ;;  %v410_v28 = vpop.f32.mrb[2].mxu1 }
 0x136   : > { %v1250_v29 = vpop.f32.mrb[3].mxu0  ;;  %v411_v30 = vadd.f32 %v410_v28, %v342_v27  ;;  %v1262_v31 = vpop.f32.mrb[3].mxu1 }
 0x143   : > { %v487_v37 = vpop.f32.mrb[4].mxu0 }
 0x144   : > { %v494_v39 = vadd.f32 %v487_v37, %v408_v25  ;;  %v1273_v40 = vpop.f32.mrb[5].mxu0 }
 0x145   : > { %v490_v41 = vpop.f32.mrb[6].mxu0 }
 0x146   : > { %v503_v42 = vadd.f32 %v1176_v38, %v494_v39  ;;  %v495_v44 = vadd.f32 %v490_v41, %v411_v30  ;;  %v1274_v45 = vpop.f32.mrb[7].mxu0  ;;  %v1397_v39 = vld [vmem:[#allocation6] sm:$0xff]  }
 0x147   : > { %1288 = vmatpush3.bf16.msra.mxu0 %v1397_v39 }
 0x148   : > { %v505_v46 = vmax.f32 %v503_v42, 0.0  ;;  %v504_v47 = vadd.f32 %v1176_v38, %v495_v44  ;;  %v1398_v44 = vld [vmem:[#allocation6 + $0x28] sm:$0xff]   ;;  %1289 = vmatprep.subr.bf16.mxu0 %v1540_v0 }
 0x149   : > { %1278 = vmatpush3.bf16.msra.mxu1 %v1398_v44 }
 0x14a   : > { %v509_v48 = vcombine.high %v505_v46, %v505_v46  ;;  %v516_v49 = vrot.slane %v505_v46, %v1744_v43  ;;  %v506_v50 = vmax.f32 %v504_v47, 0.0  ;;  %v1399_v47 = vld [vmem:[#allocation6 + $0x8] sm:$0xff]   ;;  %1279 = vmatprep.subr.bf16.mxu1 %v1540_v0 }
 0x14b   : > { %1290 = vmatpush3.bf16.msra.mxu0 %v1399_v47 }
 0x14c   : > { %v526_v51 = vcombine.high %v506_v50, %v506_v50  ;;  %v533_v52 = vrot.slane %v506_v50, %v1744_v43  ;;  %v1177_v53 = vrot.slane %v516_v49, 9  ;;  %v523_v54 = vrot.slane %v509_v48, %v1744_v43  ;;  %v1401_v50 = vld [vmem:[#allocation6 + $0x10] sm:$0xff]   ;;  %1291 = vmatprep.subr.bf16.mxu0 %v1540_v0 }
 0x14d   : > { %v524_v55 = vcombine.high %v516_v49, %v516_v49 }
 0x14e   : > { %v575_v56 = vmax.f32 %v516_v49, %v1177_v53  ;;  %v1179_v57 = vrot.slane %v523_v54, 9  ;;  %v525_v58 = vcombine.high %v523_v54, %v523_v54  ;;  %v540_v60 = vrot.slane %v526_v51, %v1744_v43  ;;  %v1400_v49 = vld [vmem:[#allocation6 + $0x30] sm:$0xff]   ;;  %v1402_v51 = vld [vmem:[#allocation6 + $0x38] sm:$0xff]  }
 0x14f   : > { %v1178_v59 = vrot.slane %v524_v55, 9  ;;  %v541_v63 = vcombine.high %v533_v52, %v533_v52  ;;  %v1181_v2 = vrot.slane %v533_v52, 9  ;;  %1280 = vmatpush3.bf16.msra.mxu1 %v1400_v49  ;;  %1292 = vmatpush3.bf16.msra.mxu0 %v1401_v50 }
 0x150   : > { %591 = vrot.lane.b32.xlu0 %v575_v56, %s1543_s12  ;;  %v577_v61 = vmax.f32 %v523_v54, %v1179_v57  ;;  %v1180_v62 = vrot.slane %v525_v58, 9  ;;  %v542_v5 = vcombine.high %v540_v60, %v540_v60  ;;  %v1183_v7 = vrot.slane %v540_v60, 9  ;;  %1281 = vmatprep.subr.bf16.mxu1 %v1540_v0 }
 0x151   : > { %v576_v1 = vmax.f32 %v524_v55, %v1178_v59  ;;  %v1182_v4 = vrot.slane %v541_v63, 9  ;;  %v579_v6 = vmax.f32 %v533_v52, %v1181_v2  ;;  %v1403_v52 = vld [vmem:[#allocation6 + $0x18] sm:$0xff]   ;;  %1293 = vmatprep.subr.bf16.mxu0 %v1540_v0 }
 0x152   : > { %595 = vrot.lane.b32.xlu1 %v577_v61, %s1543_s12  ;;  %v578_v3 = vmax.f32 %v525_v58, %v1180_v62  ;;  %v1184_v9 = vrot.slane %v542_v5, 9  ;;  %v581_v10 = vmax.f32 %v540_v60, %v1183_v7 }
 0x153   : > { %v580_v8 = vmax.f32 %v541_v63, %v1182_v4  ;;  %1282 = vmatpush3.bf16.msra.mxu1 %v1402_v51  ;;  %1294 = vmatpush3.bf16.msra.mxu0 %v1403_v52 }
 0x154   : > { %593 = vrot.lane.b32.xlu0 %v576_v1, %s1543_s12  ;;  %v582_v11 = vmax.f32 %v542_v5, %v1184_v9  ;;  %1299 = vmatprep.subr.bf16.mxu1 %v1540_v0  ;;  %v1405_v9 = vld [vmem:[#allocation6 + $0x48] sm:$0xff]  }
 0x156   : > { %597 = vrot.lane.b32.xlu1 %v578_v3, %s1543_s12 }
 0x158   : > { %599 = vrot.lane.b32.xlu0 %v579_v6, %s1543_s12 }
 0x15a   : > { %601 = vrot.lane.b32.xlu1 %v580_v8, %s1543_s12 }
 0x15c   : > { %603 = vrot.lane.b32.xlu0 %v581_v10, %s1543_s12 }
 0x15e   : > { %605 = vrot.lane.b32.xlu1 %v582_v11, %s1543_s12 }
 0x1c2   : > { %v592_v12 = vpop.permute.xlu0 %591 }
 0x1c3   : > { %v615_v15 = vmax.f32 %v575_v56, %v592_v12 }
 0x1c4   : > { %v596_v13 = vpop.permute.xlu1 %595 }
 0x1c5   : > { %v617_v16 = vmax.f32 %v577_v61, %v596_v13  ;;  %v634_v20 = vrot.slane %v615_v15, %v1758_v14 }
 0x1c6   : > { %v594_v17 = vpop.permute.xlu0 %593 }
 0x1c7   : > { %v616_v18 = vmax.f32 %v576_v1, %v594_v17  ;;  %v642_v23 = vrot.slane %v617_v16, %v1758_v14 }
 0x1c8   : > { %v598_v19 = vpop.permute.xlu1 %597 }
 0x1c9   : > { %v638_v21 = vrot.slane %v616_v18, %v1758_v14  ;;  %v618_v22 = vmax.f32 %v578_v3, %v598_v19 }
 0x1ca   : > { %v600_v24 = vpop.permute.xlu0 %599 }
 0x1cb   : > { %v664_v25 = vsel %vm663_vm2, %v638_v21, %v634_v20  ;;  %v646_v26 = vrot.slane %v618_v22, %v1758_v14  ;;  %v619_v27 = vmax.f32 %v579_v6, %v600_v24  ;;  %v1404_v6 = vld [vmem:[#allocation6 + $0x40] sm:$0xff]  }
 0x1cc   : > { %v666_v28 = vsel %vm665_vm3, %v642_v23, %v664_v25  ;;  %v602_v29 = vpop.permute.xlu1 %601  ;;  %v1200_v25 = vld [vmem:[%s1868_s4] ss:$0 sm:$0xff] }
 0x1cd   : > { %v668_v30 = vsel %vm667_vm4, %v646_v26, %v666_v28  ;;  %v650_v31 = vrot.slane %v619_v27, %v1758_v14  ;;  %v620_v32 = vmax.f32 %v580_v8, %v602_v29 }
 0x1ce   : > { %v604_v34 = vpop.permute.xlu0 %603 }
 0x1cf   : > { %v670_v35 = vsel %vm669_vm5, %v650_v31, %v668_v30  ;;  %v654_v36 = vrot.slane %v620_v32, %v1758_v14  ;;  %v621_v37 = vmax.f32 %v581_v10, %v604_v34  ;;  %vm711_vm5 = vcmask 457728   ;;  %v1406_v10 = vld [vmem:[#allocation6 + $0x50] sm:$0xff]  }
 0x1d0   : > { %v606_v38 = vpop.permute.xlu1 %605 }
 0x1d1   : > { %v672_v40 = vsel %vm671_vm6, %v654_v36, %v670_v35  ;;  %v658_v41 = vrot.slane %v621_v37, %v1758_v14  ;;  %v622_v42 = vmax.f32 %v582_v11, %v606_v38  ;;  %v1407_v11 = vld [vmem:[#allocation6 + $0x58] sm:$0xff]  }
 0x1d3   : > { %v674_v45 = vsel %vm673_vm7, %v658_v41, %v672_v40  ;;  %v662_v46 = vrot.slane %v622_v42, %v1758_v14 }
 0x1d5   : > { %v676_v48 = vsel %vm675_vm8, %v662_v46, %v674_v45 }
 0x1d6   : > { %681 = vrot.lane.b32.xlu1 %v676_v48, %s1544_s13  ;;  %678 = vrot.lane.b32.xlu0 %v676_v48, %s1543_s12 }
 0x1da   : > { %687 = vrot.lane.b32.xlu1 %v676_v48, %s1545_s14  ;;  %684 = vrot.lane.b32.xlu0 %v676_v48, %s1546_s15  ;;  %s1550_s14 = smov [#allocation8]  }
 0x1de   : > { %693 = vrot.lane.b32.xlu1 %v676_v48, %s1547_s16  ;;  %690 = vrot.lane.b32.xlu0 %v676_v48, %s1548_s17 }
 0x1e2   : > { %696 = vrot.lane.b32.xlu0 %v676_v48, %s1549_s7 }
 0x248   : > { %v682_v53 = vpop.permute.xlu1 %681  ;;  %v679_v54 = vpop.permute.xlu0 %678 }
 0x249   : > { %v700_v55 = vsel %vm699_vm10, %v676_v48, %v679_v54 }
 0x24a   : > { %v702_v57 = vsel %vm701_vm11, %v700_v55, %v682_v53 }
 0x24c   : > { %v688_v56 = vpop.permute.xlu1 %687  ;;  %v685_v58 = vpop.permute.xlu0 %684 }
 0x24d   : > { %v704_v59 = vsel %vm703_vm12, %v702_v57, %v685_v58 }
 0x24e   : > { %v706_v60 = vsel %vm705_vm13, %v704_v59, %v688_v56 }
 0x250   : > { %v691_v61 = vpop.permute.xlu0 %690  ;;  %v694_v62 = vpop.permute.xlu1 %693 }
 0x251   : > { %v708_v63 = vsel %vm707_vm14, %v706_v60, %v691_v61 }
 0x252   : > { %v710_v1 = vsel %vm709_vm15, %v708_v63, %v694_v62 }
 0x254   : > { %v697_v2 = vpop.permute.xlu0 %696 }
 0x255   : > { %v712_v3 = vsel %vm711_vm5, %v710_v1, %v697_v2 }
 0x256   : > { %716 = vst.msk [vmem:[#allocation2 + $0x1] sm:$0xff] %vm301_vm1, %v712_v3 }
 0x25d   : > { %v727_v4 = vld [vmem:[#allocation2 + $0x1] sm:$0xff] }
 0x25e   : > { %v717_v5 = vld [vmem:[#allocation2] sm:$0xff]  ;;  %v728_v7 = vpack.c.bf16 %v727_v4, %v727_v4 }
 0x25f   : > { %v718_v8 = vpack.c.bf16 %v717_v5, %v717_v5  ;;  %v872_v12 = vld [vmem:[#allocation2 + $0x2] sm:$0xff] }
 0x260   : > { %1284 = vmatmul.mubr.msk.bf16.vlgmr.msra.gmra.mrb[4].mxu1 %vm301_vm1, %v728_v7  ;;  %v873_v13 = vpack.c.bf16 %v872_v12, %v872_v12 }
 0x261   : > { %1296 = vmatmul.mubr.msk.bf16.vlgmr.msra.gmra.mrb[8].mxu0 %vm301_vm1, %v718_v8  ;;  %1300 = vmatpush3.bf16.msra.mxu1 %v1404_v6 }
 0x262   : > { %1307 = vmatprep.mubr.msk.bf16.mxu1 %vm1541_vm0, %v1540_v0  ;;  %1301 = vmatprep.subr.bf16.mxu1 %v1540_v0  ;;  %vm1054_vm0 = vcmask 257024  }
 0x265   : > { %1302 = vmatpush3.bf16.msra.mxu1 %v1405_v9 }
 0x266   : > { %1303 = vmatprep.subr.bf16.mxu1 %v1540_v0 }
 0x269   : > { %1304 = vmatpush3.bf16.msra.mxu1 %v1406_v10 }
 0x26a   : > { %1305 = vmatprep.subr.bf16.mxu1 %v1540_v0 }
 0x26d   : > { %1306 = vmatpush3.bf16.msra.mxu1 %v1407_v11 }
 0x270   : > { %1308 = vmatmul.mubr.msk.bf16.vlgmr.msra.gmra.mrb[8].mxu1 %vm301_vm1, %v873_v13 }
 0x333   : > { %v799_v15 = vpop.f32.mrb[4].mxu1 }
 0x334   : > { %v866_v16 = vpop.f32.mrb[8].mxu0  ;;  %v1285_v18 = vpop.f32.mrb[5].mxu1 }
 0x335   : > { %v867_v17 = vadd.f32 %v866_v16, %v799_v15  ;;  %v1297_v19 = vpop.f32.mrb[9].mxu0  ;;  %v802_v20 = vpop.f32.mrb[6].mxu1 }
 0x336   : > { %v869_v21 = vpop.f32.mrb[10].mxu0  ;;  %v1286_v22 = vpop.f32.mrb[7].mxu1 }
 0x337   : > { %v1298_v23 = vpop.f32.mrb[11].mxu0 }
 0x343   : > { %v944_v24 = vpop.f32.mrb[8].mxu1 }
 0x344   : > { %v950_v0 = vadd.f32 %v944_v24, %v867_v17  ;;  %v1309_v26 = vpop.f32.mrb[9].mxu1 }
 0x345   : > { %v947_v27 = vpop.f32.mrb[10].mxu1 }
 0x346   : > { %v958_v28 = vadd.f32 %v1200_v25, %v950_v0  ;;  %v1310_v29 = vpop.f32.mrb[11].mxu1 }
 0x348   : > { %v959_v30 = vmax.f32 %v958_v28, 0.0 }
 0x34a   : > { %v961_v31 = vcombine.high %v959_v30, %v959_v30  ;;  %v968_v32 = vrot.slane %v959_v30, %v1744_v43 }
 0x34c   : > { %v975_v33 = vrot.slane %v961_v31, %v1744_v43  ;;  %v1201_v34 = vrot.slane %v968_v32, 9  ;;  %v976_v35 = vcombine.high %v968_v32, %v968_v32 }
 0x34e   : > { %v994_v36 = vmax.f32 %v968_v32, %v1201_v34  ;;  %v1202_v37 = vrot.slane %v976_v35, 9  ;;  %v1203_v38 = vrot.slane %v975_v33, 9  ;;  %v977_v39 = vcombine.high %v975_v33, %v975_v33 }
 0x350   : > { %1002 = vrot.lane.b32.xlu1 %v994_v36, %s1543_s12  ;;  %v995_v40 = vmax.f32 %v976_v35, %v1202_v37  ;;  %v1204_v41 = vrot.slane %v977_v39, 9  ;;  %v996_v42 = vmax.f32 %v975_v33, %v1203_v38 }
 0x352   : > { %1004 = vrot.lane.b32.xlu0 %v995_v40, %s1543_s12  ;;  %v997_v44 = vmax.f32 %v977_v39, %v1204_v41 }
 0x354   : > { %1006 = vrot.lane.b32.xlu1 %v996_v42, %s1543_s12 }
 0x356   : > { %1008 = vrot.lane.b32.xlu0 %v997_v44, %s1543_s12 }
 0x3c2   : > { %v1003_v45 = vpop.permute.xlu1 %1002 }
 0x3c3   : > { %v1014_v43 = vmax.f32 %v994_v36, %v1003_v45 }
 0x3c4   : > { %v1005_v46 = vpop.permute.xlu0 %1004 }
 0x3c5   : > { %v1015_v47 = vmax.f32 %v995_v40, %v1005_v46  ;;  %v1025_v49 = vrot.slane %v1014_v43, %v1758_v14 }
 0x3c6   : > { %v1007_v48 = vpop.permute.xlu1 %1006 }
 0x3c7   : > { %v1029_v50 = vrot.slane %v1015_v47, %v1758_v14  ;;  %v1016_v51 = vmax.f32 %v996_v42, %v1007_v48 }
 0x3c8   : > { %v1009_v52 = vpop.permute.xlu0 %1008 }
 0x3c9   : > { %v1038_v53 = vsel %vm663_vm2, %v1029_v50, %v1025_v49  ;;  %v1033_v54 = vrot.slane %v1016_v51, %v1758_v14  ;;  %v1017_v55 = vmax.f32 %v997_v44, %v1009_v52 }
 0x3cb   : > { %v1037_v56 = vrot.slane %v1017_v55, %v1758_v14  ;;  %v1039_v57 = vsel %vm665_vm3, %v1033_v54, %v1038_v53 }
 0x3cd   : > { %v1040_v58 = vsel %vm667_vm4, %v1037_v56, %v1039_v57 }
 0x3ce   : > { %1045 = vrot.lane.b32.xlu0 %v1040_v58, %s1544_s13  ;;  %1042 = vrot.lane.b32.xlu1 %v1040_v58, %s1543_s12  ;;  %s1821_s12 = scalar_lea.hbm %s1869_s5, %s1206_s10  ;;  %s1464_s13 = scalar_lea.vmem %s1823_s26, 64 }
 0x3cf   : > { %p1465_p12 = scmp.ne.s32.totalorder %s1823_s26, %s1464_s13 }
 0x3d1   : > { %p1466_p2 = pnand %p1465_p12, %p1882_p1 }
 0x3d2   : > { %1048 = vrot.lane.b32.xlu1 %v1040_v58, %s1546_s15  ;;  %s1468_s15 = sshll.u32 %s1550_s14, 4  ;;  %s1469_s15 = int_to_ptr.vmem [resolvable:$false] %s1468_s15 }
 0x3d3   : > { %p1467_p3 = pneg %p1466_p2  ;;  %s1470_s16 = scalar_lea.vmem %s1469_s15, 128 }
 0x3d4   : > { %p1471_p4 = scmp.lt.s32.totalorder %s1823_s26, %s1469_s15  ;;  %p1472_p7 = scmp.lt.s32.totalorder %s1470_s16, %s1464_s13 }
 0x3d6   : > { %p1473_p8 = por %p1472_p7, %p1471_p4 }
 0x3d8   : > { %p1474_p11 = pnand %p1473_p8, %p1467_p3 }
 0x440   : > { %v1043_v59 = vpop.permute.xlu1 %1042  ;;  %v1046_v60 = vpop.permute.xlu0 %1045 }
 0x441   : > { %v1051_v61 = vsel %vm699_vm10, %v1040_v58, %v1043_v59 }
 0x442   : > { %v1052_v14 = vsel %vm701_vm11, %v1051_v61, %v1046_v60 }
 0x444   : > { %v1049_v62 = vpop.permute.xlu1 %1048 }
 0x445   : > { %v1053_v63 = vsel %vm703_vm12, %v1052_v14, %v1049_v62 }
 0x446   : > { %1055 = vst.msk [vmem:[%s247_s25] sm:$0xf] %vm1054_vm0, %v1053_v63 }
 0x447   : > { %1477 = shalt.err (!%p1474_p11)
}
 0x448   : > { %s1478_s17 = scalar_lea.hbm %s1821_s12, 64  ;;  %s1482_s6 = scalar_lea.hbm %s1869_s5, 128 }
 0x449   : > { %p1479_p13 = scmp.ne.s32.totalorder %s1821_s12, %s1478_s17  ;;  %p1483_p6 = scmp.lt.u32.totalorder %s1821_s12, %s1869_s5 }
 0x44a   : > { %p1484_p9 = scmp.lt.u32.totalorder %s1482_s6, %s1478_s17  ;;  %p1486_p12 = scmp.lt.u32.totalorder %s1478_s17, %s1821_s12 }
 0x44b   : > { %p1480_p5 = pnand %p1479_p13, %p1882_p1 }
 0x44c   : > { %p1485_p10 = por %p1484_p9, %p1483_p6 }
 0x44d   : > { %p1481_p0 = pneg %p1480_p5 }
 0x44e   : > { %p1487_p2 = por %p1486_p12, %p1485_p10 }
 0x450   : > { %p1488_p3 = pnand %p1487_p2, %p1481_p0 }
 0x452   : > { %1491 = shalt.err (!%p1488_p3)
}
 0x453   : > { %1320 = dma.vmem_to_hbm [thread:$0]  (%p1882_p1), %s1823_s26, 64, %s1821_s12, %s1057_s22  }
 0x454 PF: > { %p1337_p4 = scmp.ge.s32.totalorder %s1534_s21, 2  ;;  %s1082_s10 = sand.u32 1, %s1522_s18  }
 0x455   : > { %p1883_p7 = scmp.ne.s32.totalorder %s1874_s29, 0  ;;  %s1083_s25 = scalar_lea.sflag [#allocation5], %s1082_s10 }
 0x457   : > { %p1330_p8 = pnand %p1337_p4, %p1883_p7 }
 0x459   : > { %1517 = dma.done.wait (!%p1330_p8), %s1083_s25, 64  }
 0x45a   : > { %1519 = vsyncadd (!%p1330_p8), %s1083_s25, 4294967232  ;;  %p17_p11 = scmp.ge.s32.totalorder %s1606_s24, 4   ;;  %s1884_s18 = smov %s1526_s19 }
 0x45b   : > { %s1885_s19 = smov %s1530_s20  ;;  %s1886_s20 = smov %s1617_s27 }
 0x45c   : > { %s1887_s21 = smov %s1606_s24  ;;  %19 = sbr.rel (!%p17_p11) target bundleno = 5 (0x5), region = 88 }
 0x463   :  { %1088 = vsyncpa [#allocation4], 1 }
 0x464   :  { %1090 = vsyncpa [#allocation4 + $0x1], 1 }
 0x465   :  { %1091 = vsyncpa [#allocation7], 1 }
 0x466   :  { %1092 = vsyncpa [#allocation5], 1 }
 0x467   :  { %1094 = vsyncpa [#allocation5 + $0x1], 1 }

</bundles_post_ra>
